<compile_context>
chip_gen: v7x
topology: tpu7x:2x2x1
jax: 0.10.0
libtpu: 0.0.40
codegen_flags: <defaults>
</compile_context>

<pallas_src>
import jax
import jax.numpy as jnp
from jax.experimental import pallas as pl
from jax.experimental.pallas import tpu as pltpu


def se_block_kernel(x_ref, w1_ref, b1_ref, w2_ref, b2_ref, o_ref):
    # x block: (B_TILE, C, HW).  All internal math in f32 regardless of I/O dtype
    # (v5e VPU/EUP have no bf16, and pooling/matmul accumulation wants f32).
    x = x_ref[...].astype(jnp.float32)

    # Squeeze: global average pool over the spatial (lane) axis -> (B_TILE, C).
    # No explicit reshape/transpose ops in the kernel body.
    pooled = jnp.mean(x, axis=-1)

    # Excitation: Linear -> ReLU -> Linear -> Sigmoid, batched over B_TILE rows.
    h = jnp.dot(pooled, w1_ref[...].astype(jnp.float32),
                preferred_element_type=jnp.float32) + b1_ref[...].astype(jnp.float32)
    h = jnp.maximum(h, 0.0)
    z = jnp.dot(h, w2_ref[...].astype(jnp.float32),
                preferred_element_type=jnp.float32) + b2_ref[...].astype(jnp.float32)
    y = 1.0 / (1.0 + jnp.exp(-z))                       # sigmoid, (B_TILE, C)

    # Scale: broadcast the per-(batch, channel) gate over the spatial lanes.
    o_ref[...] = (x * y[:, :, None]).astype(o_ref.dtype)


def _choose_b_tile(B, per_batch_bytes, target_bytes=2 << 20):
    """Batch tile heuristic: ~1-4 MiB blocks to amortize the ~0.35 us per-grid-step
    overhead; keep >=2 grid steps (v7x has 2 TensorCores) only if that does not
    shrink blocks below ~1 MiB (v5e/v6e have a single TC)."""
    bt = max(1, min(B, target_bytes // max(per_batch_bytes, 1)))
    if bt >= B and B >= 2 and (B // 2) * per_batch_bytes >= (1 << 20):
        bt = B // 2
    while B % bt:            # snap to a divisor of B so every step is a full block
        bt -= 1
    return bt


def se_block(x, w1, b1, w2, b2, *, donate_input=False):
    """SEBlock forward.  x: (B, C, H, W); weights stored as (in, out): y = x @ W + b.

    Accepts float32 or bfloat16 x (the op is HBM-bandwidth bound, so bf16 I/O
    roughly halves wall time); internal compute stays f32.
    """
    B, C, H, W = x.shape
    HW = H * W
    Cr = w1.shape[1]

    x2 = x.reshape(B, C, HW)
    b1_2 = b1.reshape(1, Cr)
    b2_2 = b2.reshape(1, C)

    itemsize = jnp.dtype(x.dtype).itemsize
    per_batch_bytes = C * HW * itemsize
    b_tile = _choose_b_tile(B, per_batch_bytes)
    grid = (B // b_tile,)

    # Explicit VMEM budget: input + output blocks, each double-buffered, plus
    # slack; clamped so it stays under v7x's 64 MiB per-core ceiling.
    block_bytes = b_tile * per_batch_bytes
    vmem_limit = int(min(max(4 * block_bytes + (8 << 20), 32 << 20), 60 << 20))

    # TODO(synk): for production shapes where a full (C, HW) slab per batch no
    # longer fits in VMEM, fall back to a two-pass design (pool pass + scale pass)
    # that tiles HW.

    out = pl.pallas_call(
        se_block_kernel,
        out_shape=jax.ShapeDtypeStruct((B, C, HW), x.dtype),
        grid=grid,
        in_specs=[
            pl.BlockSpec((b_tile, C, HW), lambda b: (b, 0, 0)),
            pl.BlockSpec((C, Cr), lambda b: (0, 0)),
            pl.BlockSpec((1, Cr), lambda b: (0, 0)),
            pl.BlockSpec((Cr, C), lambda b: (0, 0)),
            pl.BlockSpec((1, C), lambda b: (0, 0)),
        ],
        out_specs=pl.BlockSpec((b_tile, C, HW), lambda b: (b, 0, 0)),
        compiler_params=pltpu.CompilerParams(
            dimension_semantics=("parallel",),
            vmem_limit_bytes=vmem_limit,
        ),
        # If x is dead after this call, aliasing the input buffer to the output
        # removes the extra (B, C, HW) HBM allocation.
        input_output_aliases=({0: 0} if donate_input else {}),
    )(x2, w1, b1_2, w2, b2_2)
    return out.reshape(B, C, H, W)


def reference_se_block(x, w1, b1, w2, b2):
    pooled = jnp.mean(x, axis=(2, 3))                   # (B, C)
    h = jnp.maximum(pooled @ w1 + b1, 0.0)              # (B, Cr)
    y = jax.nn.sigmoid(h @ w2 + b2)                     # (B, C)
    return x * y[:, :, None, None]


if __name__ == "__main__":
    # SEBlock(channel=64, reduction=16) -> hidden Cr = 4
    B, C, H, W = 2, 64, 16, 16
    reduction = 16
    Cr = C // reduction

    key = jax.random.PRNGKey(0)
    kx, k1, k2, k3, k4 = jax.random.split(key, 5)

    x = jax.random.normal(kx, (B, C, H, W), dtype=jnp.float32)
    # Deterministic synthetic parameters (Linear weights stored as (in, out)).
    w1 = jax.random.normal(k1, (C, Cr), dtype=jnp.float32) * 0.1
    b1 = jax.random.normal(k2, (Cr,), dtype=jnp.float32) * 0.1
    w2 = jax.random.normal(k3, (Cr, C), dtype=jnp.float32) * 0.1
    b2 = jax.random.normal(k4, (C,), dtype=jnp.float32) * 0.1

    # float32 path (strict correctness check).
    out = se_block(x, w1, b1, w2, b2)
    jax.block_until_ready(out)
    ref = reference_se_block(x, w1, b1, w2, b2)
    assert jnp.allclose(out, ref, atol=1e-5, rtol=1e-5), "f32 mismatch vs reference"

    # bfloat16 I/O path (HBM-bound op -> ~2x less traffic); internal math stays f32.
    out_bf16 = se_block(x.astype(jnp.bfloat16), w1.astype(jnp.bfloat16),
                        b1.astype(jnp.bfloat16), w2.astype(jnp.bfloat16),
                        b2.astype(jnp.bfloat16))
    jax.block_until_ready(out_bf16)
    assert out_bf16.dtype == jnp.bfloat16
    assert jnp.allclose(out_bf16.astype(jnp.float32), ref, atol=1e-1, rtol=1e-1), \
        "bf16 mismatch vs reference"

    print("KERNEL_OK")
</pallas_src>

<mosaic_0001>
module attributes {stable_mosaic.version = 11 : i64} {
  func.func @se_block_kernel(%arg0: i32, %arg1: memref<2x64x256xf32, #tpu.memory_space<vmem>>, %arg2: memref<64x4xf32, #tpu.memory_space<vmem>>, %arg3: memref<1x4xf32, #tpu.memory_space<vmem>>, %arg4: memref<4x64xf32, #tpu.memory_space<vmem>>, %arg5: memref<1x64xf32, #tpu.memory_space<vmem>>, %arg6: memref<2x64x256xf32, #tpu.memory_space<vmem>>) attributes {dimension_semantics = [#tpu.dimension_semantics<parallel>], iteration_bounds = array<i64: 1>, scalar_prefetch = 0 : i64, scratch_operands = 0 : i64, tpu.core_type = #tpu.core_type<tc>, window_params = [{transform_indices = @transform_0, window_bounds = array<i64: 2, 64, 256>}, {pipeline_mode = #tpu.pipeline_mode<synchronous>, transform_indices = @transform_1, window_bounds = array<i64: 64, 4>}, {pipeline_mode = #tpu.pipeline_mode<synchronous>, transform_indices = @transform_2, window_bounds = array<i64: 1, 4>}, {pipeline_mode = #tpu.pipeline_mode<synchronous>, transform_indices = @transform_3, window_bounds = array<i64: 4, 64>}, {pipeline_mode = #tpu.pipeline_mode<synchronous>, transform_indices = @transform_4, window_bounds = array<i64: 1, 64>}, {transform_indices = @transform_5, window_bounds = array<i64: 2, 64, 256>}]} {
    %c0 = arith.constant 0 : index
    %c0_0 = arith.constant 0 : index
    %c0_1 = arith.constant 0 : index
    %0 = vector.load %arg1[%c0, %c0_0, %c0_1] : memref<2x64x256xf32, #tpu.memory_space<vmem>>, vector<2x64x256xf32>
    %cst = arith.constant dense<0.000000e+00> : vector<2x64xf32>
    %1 = vector.multi_reduction <add>, %0, %cst [2] : vector<2x64x256xf32> to vector<2x64xf32>
    %cst_2 = arith.constant 2.560000e+02 : f32
    %2 = vector.broadcast %cst_2 : f32 to vector<2x64xf32>
    %3 = arith.divf %1, %2 : vector<2x64xf32>
    %c0_3 = arith.constant 0 : index
    %c0_4 = arith.constant 0 : index
    %4 = vector.load %arg2[%c0_3, %c0_4] : memref<64x4xf32, #tpu.memory_space<vmem>>, vector<64x4xf32>
    %cst_5 = arith.constant dense<0.000000e+00> : vector<2x4xf32>
    %5 = tpu.matmul %3, %4, %cst_5 {dimension_numbers = #tpu.dot_dimension_numbers<[1], [0], [0], [1], [0, 0, 1, 1], [], []>} : vector<2x64xf32>, vector<64x4xf32>, vector<2x4xf32> -> vector<2x4xf32>
    %c0_6 = arith.constant 0 : index
    %c0_7 = arith.constant 0 : index
    %6 = vector.load %arg3[%c0_6, %c0_7] : memref<1x4xf32, #tpu.memory_space<vmem>>, vector<1x4xf32>
    %7 = vector.broadcast %6 : vector<1x4xf32> to vector<2x4xf32>
    %8 = arith.addf %5, %7 : vector<2x4xf32>
    %cst_8 = arith.constant 0.000000e+00 : f32
    %9 = vector.broadcast %cst_8 : f32 to vector<2x4xf32>
    %10 = arith.maximumf %8, %9 : vector<2x4xf32>
    %c0_9 = arith.constant 0 : index
    %c0_10 = arith.constant 0 : index
    %11 = vector.load %arg4[%c0_9, %c0_10] : memref<4x64xf32, #tpu.memory_space<vmem>>, vector<4x64xf32>
    %cst_11 = arith.constant dense<0.000000e+00> : vector<2x64xf32>
    %12 = tpu.matmul %10, %11, %cst_11 {dimension_numbers = #tpu.dot_dimension_numbers<[1], [0], [0], [1], [0, 0, 1, 1], [], []>} : vector<2x4xf32>, vector<4x64xf32>, vector<2x64xf32> -> vector<2x64xf32>
    %c0_12 = arith.constant 0 : index
    %c0_13 = arith.constant 0 : index
    %13 = vector.load %arg5[%c0_12, %c0_13] : memref<1x64xf32, #tpu.memory_space<vmem>>, vector<1x64xf32>
    %14 = vector.broadcast %13 : vector<1x64xf32> to vector<2x64xf32>
    %15 = arith.addf %12, %14 : vector<2x64xf32>
    %cst_14 = arith.constant 0.000000e+00 : f32
    %16 = vector.broadcast %cst_14 : f32 to vector<2x64xf32>
    %17 = arith.subf %16, %15 : vector<2x64xf32>
    %18 = math.exp %17 : vector<2x64xf32>
    %cst_15 = arith.constant 1.000000e+00 : f32
    %19 = vector.broadcast %cst_15 : f32 to vector<2x64xf32>
    %20 = arith.addf %19, %18 : vector<2x64xf32>
    %cst_16 = arith.constant 1.000000e+00 : f32
    %21 = vector.broadcast %cst_16 : f32 to vector<2x64xf32>
    %22 = arith.divf %21, %20 : vector<2x64xf32>
    %23 = vector.shape_cast %22 : vector<2x64xf32> to vector<2x64x1xf32>
    %24 = vector.broadcast %23 : vector<2x64x1xf32> to vector<2x64x256xf32>
    %25 = arith.mulf %0, %24 : vector<2x64x256xf32>
    %c0_17 = arith.constant 0 : index
    %c0_18 = arith.constant 0 : index
    %c0_19 = arith.constant 0 : index
    %26 = vector.load %arg6[%c0_17, %c0_18, %c0_19] : memref<2x64x256xf32, #tpu.memory_space<vmem>>, vector<2x64x256xf32>
    tpu.vector_store %arg6[%c0_17, %c0_18, %c0_19], %25 {strides = array<i32>} : memref<2x64x256xf32, #tpu.memory_space<vmem>>, vector<2x64x256xf32>,
    return
  }
  func.func @transform_0(%arg0: i32) -> (i32, i32, i32) {
    %c0_i32 = arith.constant 0 : i32
    %c0_i32_0 = arith.constant 0 : i32
    %c0_i32_1 = arith.constant 0 : i32
    return %arg0, %c0_i32, %c0_i32_0 : i32, i32, i32
  }
  func.func @transform_1(%arg0: i32) -> (i32, i32) {
    %c0_i32 = arith.constant 0 : i32
    %c0_i32_0 = arith.constant 0 : i32
    %c0_i32_1 = arith.constant 0 : i32
    return %c0_i32, %c0_i32_0 : i32, i32
  }
  func.func @transform_2(%arg0: i32) -> (i32, i32) {
    %c0_i32 = arith.constant 0 : i32
    %c0_i32_0 = arith.constant 0 : i32
    %c0_i32_1 = arith.constant 0 : i32
    return %c0_i32, %c0_i32_0 : i32, i32
  }
  func.func @transform_3(%arg0: i32) -> (i32, i32) {
    %c0_i32 = arith.constant 0 : i32
    %c0_i32_0 = arith.constant 0 : i32
    %c0_i32_1 = arith.constant 0 : i32
    return %c0_i32, %c0_i32_0 : i32, i32
  }
  func.func @transform_4(%arg0: i32) -> (i32, i32) {
    %c0_i32 = arith.constant 0 : i32
    %c0_i32_0 = arith.constant 0 : i32
    %c0_i32_1 = arith.constant 0 : i32
    return %c0_i32, %c0_i32_0 : i32, i32
  }
  func.func @transform_5(%arg0: i32) -> (i32, i32, i32) {
    %c0_i32 = arith.constant 0 : i32
    %c0_i32_0 = arith.constant 0 : i32
    %c0_i32_1 = arith.constant 0 : i32
    return %arg0, %c0_i32, %c0_i32_0 : i32, i32, i32
  }
}

</mosaic_0001>

<bundles_post_ra>
// kernel: tpu_custom_call.1
= control target key start
LH: loop header
LB: loop body
LE: loop exit
PB: predicated region body
PF: predicated region fallthrough
CT: control target
= control target key end

     0   :  { %10 = vsyncpa [#allocation3], 0  ;;  %s939_s0 = inlined_call_operand.hbm [shape: f32[2,64,256], index: 0, kind: input, shape index: {}]   ;;  %s940_s1 = inlined_call_operand.vmem [shape: f32[64,4], index: 1, kind: input, shape index: {}]   ;;  %s941_s2 = inlined_call_operand.vmem [shape: f32[1,4], index: 2, kind: input, shape index: {}]   ;;  %s942_s3 = inlined_call_operand.vmem [shape: f32[4,64], index: 3, kind: input, shape index: {}]   ;;  %s943_s4 = inlined_call_operand.vmem [shape: f32[1,64], index: 4, kind: input, shape index: {}]   ;;  %s944_s5 = inlined_call_operand.hbm [shape: f32[2,64,256], index: 5, kind: output, shape index: {}]  }
   0x1   :  { %11 = vsyncpa [#allocation4], 0  ;;  %s687_s18 = smov [#allocation2]   ;;  %s639_s22 = scalar_lea.hbm %s939_s0, 4096 }
   0x2   :  { %s17_s19 = sshll.u32 %s687_s18, 4  ;;  %p640_p0 = scmp.ne.s32.totalorder %s939_s0, %s639_s22  ;;  %s18_s19 = int_to_ptr.vmem [resolvable:$true] %s17_s19 }
   0x3   :  { %p643_p1 = scmp.lt.u32.totalorder %s639_s22, %s939_s0 }
   0x5   :  { %p645_p2 = pnand %p643_p1, %p640_p0 }
   0x7   :  { %648 = shalt.err (!%p645_p2)
}
   0x8   :  { %s649_s27 = scalar_lea.vmem %s18_s19, 4096  ;;  %p654_p4 = scmp.lt.s32.totalorder %s18_s19, %s18_s19 }
   0x9   :  { %p650_p3 = scmp.ne.s32.totalorder %s18_s19, %s649_s27  ;;  %p655_p5 = scmp.lt.s32.totalorder %s649_s27, %s649_s27 }
   0xb   :  { %p656_p6 = por %p655_p5, %p654_p4 }
   0xd   :  { %p657_p7 = pnand %p656_p6, %p650_p3 }
   0xf   :  { %660 = shalt.err (!%p657_p7)
}
  0x10   :  { %s688_s28 = smov 256   ;;  %s689_s29 = smov 16  }
  0x11   :  { %23 = dma.hbm_to_vmem [thread:$0]  %s939_s0, 4096, %s18_s19, [#allocation3], %s688_s28, %s688_s28, %s689_s29  }
  0x12   :  { %683 = dma.done.wait [#allocation3], 4096  }
  0x13   :  { %684 = vsyncadd [#allocation3], 4294963200  ;;  %v739_v0 = vld [vmem:[#allocation2 + $0x80] sm:$0xff]  ;;  %v741_v1 = vld [vmem:[#allocation2 + $0x88] sm:$0xff]  ;;  %v690_v51 = vmov 0.0|0.0   ;;  %vm691_vm0 = vmmov 0  }
  0x14   :  { %v743_v2 = vld [vmem:[#allocation2] sm:$0xff]  ;;  %v91_v3 = vadd.f32 %v741_v1, %v739_v0  ;;  %v747_v4 = vld [vmem:[#allocation2 + $0x8] sm:$0xff]  ;;  %v749_v5 = vld [vmem:[#allocation2 + $0x90] sm:$0xff]  ;;  %616 = vmatprep.subr.bf16.mxu0 %v690_v51  ;;  %v692_v61 = vmov 0.0   ;;  %vm174_vm1 = vcmask 130112   ;;  %vm181_vm2 = vcmask 195712  }
  0x15   :  { %v751_v6 = vld [vmem:[#allocation2 + $0x98] sm:$0xff]  ;;  %v67_v7 = vadd.f32 %v747_v4, %v743_v2  ;;  %v755_v8 = vld [vmem:[#allocation2 + $0x10] sm:$0xff]  ;;  %v763_v12 = vld [vmem:[#allocation2 + $0xa0] sm:$0xff]  ;;  %608 = vmatprep.mubr.msk.f32.mxu0 %vm691_vm0, %v692_v61  ;;  %611 = vmatprep.subr.mxu1 %v692_v61  ;;  %vm188_vm3 = vcmask 261312   ;;  %vm195_vm4 = vcmask 326912   ;;  %vm202_vm5 = vcmask 392512  }
  0x16   :  { %v757_v9 = vld [vmem:[#allocation2 + $0x18] sm:$0xff]  ;;  %92 = vadd.xlane.f32.xlu1 %v91_v3  ;;  %v94_v10 = vadd.f32 %v751_v6, %v749_v5  ;;  %v765_v13 = vld [vmem:[#allocation2 + $0xa8] sm:$0xff]  ;;  %v767_v14 = vld [vmem:[#allocation2 + $0x20] sm:$0xff]  ;;  %613 = vmatprep.mubr.msk.f32.mxu1 %vm691_vm0, %v692_v61  ;;  %vm209_vm6 = vcmask 458112   ;;  %vm216_vm7 = vcmask 523712   ;;  %vm257_vm8 = vcmask 1041409  }
  0x17   :  { %68 = vadd.xlane.f32.xlu0 %v67_v7  ;;  %v70_v11 = vadd.f32 %v757_v9, %v755_v8  ;;  %v769_v15 = vld [vmem:[#allocation2 + $0x28] sm:$0xff]  ;;  %v97_v16 = vadd.f32 %v765_v13, %v763_v12  ;;  %v775_v18 = vld [vmem:[#allocation2 + $0xb0] sm:$0xff]  ;;  %v777_v19 = vld [vmem:[#allocation2 + $0xb8] sm:$0xff]  ;;  %vm259_vm9 = vcmask 523264   ;;  %vm345_vm10 = vcmask 1043456  }
  0x18   :  { %v73_v17 = vadd.f32 %v769_v15, %v767_v14  ;;  %952 = vst [vmem:[#allocation8_spill] sm:$0xff] %v777_v19  ;;  %v779_v20 = vld [vmem:[#allocation2 + $0x30] sm:$0xff]  ;;  %v781_v21 = vld [vmem:[#allocation2 + $0x38] sm:$0xff]  ;;  %v100_v22 = vadd.f32 %v777_v19, %v775_v18  ;;  %v787_v24 = vld [vmem:[#allocation2 + $0xc0] sm:$0xff]  ;;  %vm341_vm11 = vcmask 31744  }
  0x19   :  { %v76_v23 = vadd.f32 %v781_v21, %v779_v20  ;;  %v789_v25 = vld [vmem:[#allocation2 + $0xc8] sm:$0xff]  ;;  %v791_v26 = vld [vmem:[#allocation2 + $0x40] sm:$0xff]  ;;  %v799_v30 = vld [vmem:[#allocation2 + $0xd0] sm:$0xff] }
  0x1a   :  { %95 = vadd.xlane.f32.xlu1 %v94_v10  ;;  %v793_v27 = vld [vmem:[#allocation2 + $0x48] sm:$0xff]  ;;  %v103_v28 = vadd.f32 %v789_v25, %v787_v24  ;;  %953 = vst [vmem:[#allocation9_spill] sm:$0xff] %v799_v30  ;;  %v801_v31 = vld [vmem:[#allocation2 + $0xd8] sm:$0xff]  ;;  %v803_v32 = vld [vmem:[#allocation2 + $0x50] sm:$0xff]  ;;  %v163_v10 = vlaneseq }
  0x1b   :  { %71 = vadd.xlane.f32.xlu0 %v70_v11  ;;  %v79_v29 = vadd.f32 %v793_v27, %v791_v26  ;;  %954 = vst [vmem:[#allocation10_spill] sm:$0xff] %v801_v31  ;;  %v805_v33 = vld [vmem:[#allocation2 + $0x58] sm:$0xff]  ;;  %v106_v34 = vadd.f32 %v801_v31, %v799_v30  ;;  %v811_v36 = vld [vmem:[#allocation2 + $0xe0] sm:$0xff]  ;;  %v813_v37 = vld [vmem:[#allocation2 + $0xe8] sm:$0xff] }
  0x1c   :  { %v82_v35 = vadd.f32 %v805_v33, %v803_v32  ;;  %955 = vst [vmem:[#allocation11_spill] sm:$0xff] %v811_v36  ;;  %956 = vst [vmem:[#allocation12_spill] sm:$0xff] %v813_v37  ;;  %v815_v38 = vld [vmem:[#allocation2 + $0x60] sm:$0xff]  ;;  %v817_v39 = vld [vmem:[#allocation2 + $0x68] sm:$0xff]  ;;  %v109_v40 = vadd.f32 %v813_v37, %v811_v36 }
  0x1d   :  { %v85_v41 = vadd.f32 %v817_v39, %v815_v38  ;;  %v823_v42 = vld [vmem:[#allocation2 + $0xf0] sm:$0xff]  ;;  %v825_v43 = vld [vmem:[#allocation2 + $0xf8] sm:$0xff]  ;;  %v132_v48 = vld [vmem:[%s940_s1] sm:$0xff] }
  0x1e   :  { %98 = vadd.xlane.f32.xlu1 %v97_v16  ;;  %957 = vst [vmem:[#allocation13_spill] sm:$0xff] %v823_v42  ;;  %958 = vst [vmem:[#allocation14_spill] sm:$0xff] %v825_v43  ;;  %v827_v44 = vld [vmem:[#allocation2 + $0x70] sm:$0xff]  ;;  %v829_v45 = vld [vmem:[#allocation2 + $0x78] sm:$0xff]  ;;  %v112_v46 = vadd.f32 %v825_v43, %v823_v42 }
  0x1f   :  { %74 = vadd.xlane.f32.xlu0 %v73_v17  ;;  %v88_v47 = vadd.f32 %v829_v45, %v827_v44  ;;  %v133_v49 = vld [vmem:[%s940_s1 + $0x8] sm:$0xff]  ;;  %v134_v52 = vld [vmem:[%s940_s1 + $0x10] sm:$0xff]  ;;  %v135_v53 = vld [vmem:[%s940_s1 + $0x18] sm:$0xff]  ;;  %v164_v17 = vand.u32 127, %v163_v10 }
  0x20   :  { %v617_v50 = vpack.c.bf16 %v133_v49, %v132_v48  ;;  %v620_v54 = vpack.c.bf16 %v135_v53, %v134_v52  ;;  %v136_v55 = vld [vmem:[%s940_s1 + $0x20] sm:$0xff]  ;;  %v137_v56 = vld [vmem:[%s940_s1 + $0x28] sm:$0xff]  ;;  %v138_v58 = vld [vmem:[%s940_s1 + $0x30] sm:$0xff] }
  0x21   :  { %v623_v57 = vpack.c.bf16 %v137_v56, %v136_v55  ;;  %v139_v59 = vld [vmem:[%s940_s1 + $0x38] sm:$0xff] }
  0x22   :  { %101 = vadd.xlane.f32.xlu1 %v100_v22  ;;  %618 = vmatpush3.bf16.msra.mxu0 %v617_v50  ;;  %v626_v60 = vpack.c.bf16 %v139_v59, %v138_v58 }
  0x23   :  { %77 = vadd.xlane.f32.xlu0 %v76_v23  ;;  %619 = vmatprep.subr.bf16.mxu0 %v690_v51  ;;  %v859_v23 = vshrl.u32 %v163_v10, 7 }
  0x26   :  { %104 = vadd.xlane.f32.xlu1 %v103_v28  ;;  %621 = vmatpush3.bf16.msra.mxu0 %v620_v54 }
  0x27   :  { %80 = vadd.xlane.f32.xlu0 %v79_v29  ;;  %622 = vmatprep.subr.bf16.mxu0 %v690_v51  ;;  %v169_v29 = vadd.s32 4294967288, %v164_v17 }
  0x29   :  { %v172_v49 = vsub.s32 %v169_v29, %v859_v23 }
  0x2a   :  { %107 = vadd.xlane.f32.xlu1 %v106_v34  ;;  %624 = vmatpush3.bf16.msra.mxu0 %v623_v57  ;;  %v176_v34 = vadd.s32 4294967280, %v164_v17 }
  0x2b   :  { %83 = vadd.xlane.f32.xlu0 %v82_v35  ;;  %625 = vmatprep.subr.bf16.mxu0 %v690_v51  ;;  %v183_v35 = vadd.s32 4294967272, %v164_v17  ;;  %v204_v51 = vadd.s32 4294967248, %v164_v17 }
  0x2c   :  { %v179_v50 = vsub.s32 %v176_v34, %v859_v23 }
  0x2d   :  { %v186_v53 = vsub.s32 %v183_v35, %v859_v23 }
  0x2e   :  { %110 = vadd.xlane.f32.xlu1 %v109_v40  ;;  %627 = vmatpush3.bf16.msra.mxu0 %v626_v60  ;;  %v190_v40 = vadd.s32 4294967264, %v164_v17 }
  0x2f   :  { %86 = vadd.xlane.f32.xlu0 %v85_v41 }
  0x30   :  { %v193_v54 = vsub.s32 %v190_v40, %v859_v23  ;;  %v211_v40 = vadd.s32 4294967240, %v164_v17 }
  0x32   :  { %113 = vadd.xlane.f32.xlu1 %v112_v46  ;;  %v197_v46 = vadd.s32 4294967256, %v164_v17 }
  0x33   :  { %89 = vadd.xlane.f32.xlu0 %v88_v47  ;;  %v167_v47 = vsub.s32 %v164_v17, %v859_v23  ;;  %v214_v17 = vsub.s32 %v211_v40, %v859_v23  ;;  %v576_v40 = vld [vmem:[%s941_s2] ss:$0 sm:$0xff]  ;;  %s693_s2 = smov [#allocation5]  }
  0x34   :  { %v200_v57 = vsub.s32 %v197_v46, %v859_v23 }
  0xa3   :  { %v93_v62 = vpop.xlane.xlu1 %92 }
  0xa4   :  { %v69_v63 = vpop.xlane.xlu0 %68  ;;  %v124_v59 = vmul.f32 0.00390625, %v93_v62 }
  0xa5   :  { %v116_v29 = vmul.f32 0.00390625, %v69_v63 }
  0xa6   :  { %v221_v37 = vrot.slane %v124_v59, %v167_v47 }
  0xa7   :  { %v96_v3 = vpop.xlane.xlu1 %95  ;;  %v168_v19 = vrot.slane %v116_v29, %v167_v47 }
  0xa8   :  { %v72_v7 = vpop.xlane.xlu0 %71  ;;  %v125_v52 = vmul.f32 0.00390625, %v96_v3  ;;  %v207_v3 = vsub.s32 %v204_v51, %v859_v23 }
  0xa9   :  { %v117_v55 = vmul.f32 0.00390625, %v72_v7 }
  0xaa   :  { %v225_v35 = vrot.slane %v125_v52, %v172_v49 }
  0xab   :  { %v99_v11 = vpop.xlane.xlu1 %98  ;;  %v173_v7 = vrot.slane %v117_v55, %v172_v49 }
  0xac   :  { %v75_v16 = vpop.xlane.xlu0 %74  ;;  %v126_v56 = vmul.f32 0.00390625, %v99_v11  ;;  %v226_v51 = vsel %vm174_vm1, %v225_v35, %v221_v37  ;;  %v333_v35 = vld [vmem:[%s942_s3] sm:$0xf]  ;;  %s564_s3 = sshll.u32 %s693_s2, 4  ;;  %s565_s3 = int_to_ptr.vmem [resolvable:$true] %s564_s3 }
  0xad   :  { %v118_v60 = vmul.f32 0.00390625, %v75_v16  ;;  %v175_v49 = vsel %vm174_vm1, %v173_v7, %v168_v19  ;;  %612 = vmatpush3.msk.msra.mxu1 %vm345_vm10, %v333_v35  ;;  %p666_p9 = scmp.lt.s32.totalorder %s565_s3, %s565_s3 }
  0xae   :  { %v230_v11 = vrot.slane %v126_v56, %v179_v50 }
  0xaf   :  { %v102_v22 = vpop.xlane.xlu1 %101  ;;  %v180_v62 = vrot.slane %v118_v60, %v179_v50 }
  0xb0   :  { %v78_v28 = vpop.xlane.xlu0 %77  ;;  %v127_v61 = vmul.f32 0.00390625, %v102_v22  ;;  %v231_v55 = vsel %vm181_vm2, %v230_v11, %v226_v51 }
  0xb1   :  { %v119_v34 = vmul.f32 0.00390625, %v78_v28  ;;  %v182_v59 = vsel %vm181_vm2, %v180_v62, %v175_v49 }
  0xb2   :  { %v235_v16 = vrot.slane %v127_v61, %v186_v53 }
  0xb3   :  { %v105_v41 = vpop.xlane.xlu1 %104  ;;  %v187_v63 = vrot.slane %v119_v34, %v186_v53 }
  0xb4   :  { %v81_v48 = vpop.xlane.xlu0 %80  ;;  %v128_v43 = vmul.f32 0.00390625, %v105_v41  ;;  %v236_v47 = vsel %vm188_vm3, %v235_v16, %v231_v55  ;;  %v578_v16 = vld [vmem:[%s943_s4] ss:$0 sm:$0xff]  ;;  %s661_s4 = scalar_lea.vmem %s565_s3, 4096 }
  0xb5   :  { %v120_v42 = vmul.f32 0.00390625, %v81_v48  ;;  %v189_v37 = vsel %vm188_vm3, %v187_v63, %v182_v59  ;;  %p662_p8 = scmp.ne.s32.totalorder %s565_s3, %s661_s4  ;;  %p667_p10 = scmp.lt.s32.totalorder %s661_s4, %s661_s4 }
  0xb6   :  { %v240_v28 = vrot.slane %v128_v43, %v193_v54 }
  0xb7   :  { %v108_v58 = vpop.xlane.xlu1 %107  ;;  %v194_v52 = vrot.slane %v120_v42, %v193_v54  ;;  %p668_p11 = por %p667_p10, %p666_p9 }
  0xb8   :  { %v84_v10 = vpop.xlane.xlu0 %83  ;;  %v129_v31 = vmul.f32 0.00390625, %v108_v58 }
  0xb9   :  { %v121_v30 = vmul.f32 0.00390625, %v84_v10  ;;  %v196_v19 = vsel %vm195_vm4, %v194_v52, %v189_v37  ;;  %p669_p12 = pnand %p668_p11, %p662_p8 }
  0xba   :  { %v245_v48 = vrot.slane %v129_v31, %v200_v57  ;;  %v241_v31 = vsel %vm195_vm4, %v240_v28, %v236_v47 }
  0xbb   :  { %v111_v46 = vpop.xlane.xlu1 %110  ;;  %v201_v56 = vrot.slane %v121_v30, %v200_v57 }
  0xbc   :  { %v130_v22 = vmul.f32 0.00390625, %v111_v46  ;;  %v87_v36 = vpop.xlane.xlu0 %86  ;;  %v246_v54 = vsel %vm202_vm5, %v245_v48, %v241_v31 }
  0xbd   :  { %v122_v41 = vmul.f32 0.00390625, %v87_v36  ;;  %v203_v57 = vsel %vm202_vm5, %v201_v56, %v196_v19  ;;  %v462_v56 = vsub.s32 1, %v859_v23 }
  0xbe   :  { %v250_v58 = vrot.slane %v130_v22, %v207_v3 }
  0xbf   :  { %v114_v50 = vpop.xlane.xlu1 %113  ;;  %v208_v53 = vrot.slane %v122_v41, %v207_v3 }
  0xc0   :  { %v131_v43 = vmul.f32 0.00390625, %v114_v50  ;;  %v90_v36 = vpop.xlane.xlu0 %89  ;;  %v251_v60 = vsel %vm209_vm6, %v250_v58, %v246_v54 }
  0xc1   :  { %v123_v42 = vmul.f32 0.00390625, %v90_v36  ;;  %v210_v10 = vsel %vm209_vm6, %v208_v53, %v203_v57 }
  0xc2   :  { %v255_v30 = vrot.slane %v131_v43, %v214_v17 }
  0xc3   :  { %v215_v61 = vrot.slane %v123_v42, %v214_v17  ;;  %v427_v17 = vsub.s32 0, %v859_v23 }
  0xc4   :  { %v256_v29 = vsel %vm216_vm7, %v255_v30, %v251_v60 }
  0xc5   :  { %v217_v34 = vsel %vm216_vm7, %v215_v61, %v210_v10 }
  0xc6   :  { %v258_v3 = vsel %vm257_vm8, %v256_v29, %v217_v34 }
  0xc7   :  { %609 = vmatmul.mubr.msk.f32.vlgmr.msra.gmra.mrb[0].mxu0 %vm259_vm9, %v258_v3  ;;  %v959_v3 = vld [vmem:[#allocation8_spill] sm:$0xff] }
 0x19a   :  { %v328_v7 = vpop.f32.mrb[0].mxu0 }
 0x19b   :  { %v329_v11 = vadd.f32 %v576_v40, %v328_v7  ;;  %v610_v46 = vpop.f32.mrb[1].mxu0  ;;  %v960_v40 = vld [vmem:[#allocation11_spill] sm:$0xff] }
 0x19c   :  { %v963_v46 = vld [vmem:[#allocation10_spill] sm:$0xff] }
 0x19d   :  { %v332_v62 = vmax.f32 %v329_v11, 0.0  ;;  %v961_v11 = vld [vmem:[#allocation12_spill] sm:$0xff] }
 0x19f   :  { %614 = vmatmul.mubr.msk.f32.vlgmr.msra.gmra.mrb[0].mxu1 %vm341_vm11, %v332_v62 }
 0x272   :  { %v415_v22 = vpop.f32.mrb[0].mxu1 }
 0x273   :  { %v416_v63 = vadd.f32 %v578_v16, %v415_v22  ;;  %v615_v28 = vpop.f32.mrb[1].mxu1  ;;  %v964_v16 = vld [vmem:[#allocation13_spill] sm:$0xff] }
 0x275   :  { %v419_v41 = vsub.f32 0.0, %v416_v63  ;;  %v965_v63 = vld [vmem:[#allocation14_spill] sm:$0xff] }
 0x277   :  { %v420_v51 = vmul.f32 1.442695, %v419_v41 }
 0x279   :  { %635 = vpow2.f32 %v420_v51 }
 0x283   :  { %v636_v52 = vpop.eup %635 }
 0x284   :  { %v422_v48 = vadd.f32 1.0, %v636_v52 }
 0x286   :  { %637 = vrcp.f32 %v422_v48 }
 0x290   :  { %v638_v49 = vpop.eup %637 }
 0x291   :  { %v428_v55 = vrot.slane %v638_v49, %v427_v17  ;;  %v463_v58 = vrot.slane %v638_v49, %v462_v56 }
 0x293   :  { %434 = vbcast.lane.b32.xlu1 %v428_v55, 264  ;;  %430 = vbcast.lane.b32.xlu0 %v428_v55, 256 }
 0x297   :  { %438 = vbcast.lane.b32.xlu1 %v428_v55, 272  ;;  %446 = vbcast.lane.b32.xlu0 %v428_v55, 288 }
 0x29b   :  { %442 = vbcast.lane.b32.xlu1 %v428_v55, 280  ;;  %454 = vbcast.lane.b32.xlu0 %v428_v55, 304 }
 0x29f   :  { %450 = vbcast.lane.b32.xlu1 %v428_v55, 296  ;;  %465 = vbcast.lane.b32.xlu0 %v463_v58, 256 }
 0x2a3   :  { %458 = vbcast.lane.b32.xlu1 %v428_v55, 312  ;;  %473 = vbcast.lane.b32.xlu0 %v463_v58, 272 }
 0x2a7   :  { %469 = vbcast.lane.b32.xlu1 %v463_v58, 264  ;;  %481 = vbcast.lane.b32.xlu0 %v463_v58, 288 }
 0x2ab   :  { %477 = vbcast.lane.b32.xlu1 %v463_v58, 280  ;;  %489 = vbcast.lane.b32.xlu0 %v463_v58, 304 }
 0x2af   :  { %485 = vbcast.lane.b32.xlu1 %v463_v58, 296 }
 0x2b3   :  { %493 = vbcast.lane.b32.xlu1 %v463_v58, 312 }
 0x305   :  { %v435_v50 = vpop.permute.xlu1 %434  ;;  %v431_v59 = vpop.permute.xlu0 %430 }
 0x306   :  { %v497_v47 = vmul.f32 %v435_v50, %v755_v8  ;;  %v498_v53 = vmul.f32 %v435_v50, %v757_v9  ;;  %v495_v23 = vmul.f32 %v431_v59, %v743_v2  ;;  %v496_v43 = vmul.f32 %v431_v59, %v747_v4 }
 0x308   :  { %529 = vst [vmem:[#allocation5 + $0x10] sm:$0xff] %v497_v47  ;;  %530 = vst [vmem:[#allocation5 + $0x18] sm:$0xff] %v498_v53 }
 0x309   :  { %527 = vst [vmem:[#allocation5] sm:$0xff] %v495_v23  ;;  %528 = vst [vmem:[#allocation5 + $0x8] sm:$0xff] %v496_v43  ;;  %v439_v36 = vpop.permute.xlu1 %438  ;;  %v447_v37 = vpop.permute.xlu0 %446 }
 0x30a   :  { %v499_v31 = vmul.f32 %v439_v36, %v767_v14  ;;  %v500_v42 = vmul.f32 %v439_v36, %v769_v15  ;;  %v503_v19 = vmul.f32 %v447_v37, %v791_v26  ;;  %v504_v8 = vmul.f32 %v447_v37, %v793_v27 }
 0x30c   :  { %531 = vst [vmem:[#allocation5 + $0x20] sm:$0xff] %v499_v31  ;;  %532 = vst [vmem:[#allocation5 + $0x28] sm:$0xff] %v500_v42 }
 0x30d   :  { %535 = vst [vmem:[#allocation5 + $0x40] sm:$0xff] %v503_v19  ;;  %536 = vst [vmem:[#allocation5 + $0x48] sm:$0xff] %v504_v8  ;;  %v443_v2 = vpop.permute.xlu1 %442  ;;  %v455_v4 = vpop.permute.xlu0 %454 }
 0x30e   :  { %v501_v9 = vmul.f32 %v443_v2, %v779_v20  ;;  %v502_v54 = vmul.f32 %v443_v2, %v781_v21  ;;  %v507_v30 = vmul.f32 %v455_v4, %v815_v38  ;;  %v508_v14 = vmul.f32 %v455_v4, %v817_v39 }
 0x310   :  { %533 = vst [vmem:[#allocation5 + $0x30] sm:$0xff] %v501_v9  ;;  %534 = vst [vmem:[#allocation5 + $0x38] sm:$0xff] %v502_v54 }
 0x311   :  { %539 = vst [vmem:[#allocation5 + $0x60] sm:$0xff] %v507_v30  ;;  %540 = vst [vmem:[#allocation5 + $0x68] sm:$0xff] %v508_v14  ;;  %v451_v15 = vpop.permute.xlu1 %450  ;;  %v466_v26 = vpop.permute.xlu0 %465 }
 0x312   :  { %v505_v27 = vmul.f32 %v451_v15, %v803_v32  ;;  %v506_v57 = vmul.f32 %v451_v15, %v805_v33  ;;  %v511_v60 = vmul.f32 %v466_v26, %v739_v0  ;;  %v512_v20 = vmul.f32 %v466_v26, %v741_v1 }
 0x314   :  { %537 = vst [vmem:[#allocation5 + $0x50] sm:$0xff] %v505_v27  ;;  %538 = vst [vmem:[#allocation5 + $0x58] sm:$0xff] %v506_v57 }
 0x315   :  { %543 = vst [vmem:[#allocation5 + $0x80] sm:$0xff] %v511_v60  ;;  %544 = vst [vmem:[#allocation5 + $0x88] sm:$0xff] %v512_v20  ;;  %v459_v21 = vpop.permute.xlu1 %458  ;;  %v474_v38 = vpop.permute.xlu0 %473 }
 0x316   :  { %v509_v39 = vmul.f32 %v459_v21, %v827_v44  ;;  %v510_v61 = vmul.f32 %v459_v21, %v829_v45  ;;  %v515_v10 = vmul.f32 %v474_v38, %v763_v12  ;;  %v516_v32 = vmul.f32 %v474_v38, %v765_v13 }
 0x318   :  { %541 = vst [vmem:[#allocation5 + $0x70] sm:$0xff] %v509_v39  ;;  %542 = vst [vmem:[#allocation5 + $0x78] sm:$0xff] %v510_v61 }
 0x319   :  { %547 = vst [vmem:[#allocation5 + $0xa0] sm:$0xff] %v515_v10  ;;  %548 = vst [vmem:[#allocation5 + $0xa8] sm:$0xff] %v516_v32  ;;  %v470_v0 = vpop.permute.xlu1 %469  ;;  %v482_v1 = vpop.permute.xlu0 %481 }
 0x31a   :  { %v513_v33 = vmul.f32 %v470_v0, %v749_v5  ;;  %v514_v29 = vmul.f32 %v470_v0, %v751_v6  ;;  %v519_v34 = vmul.f32 %v482_v1, %v787_v24  ;;  %v520_v44 = vmul.f32 %v482_v1, %v789_v25  ;;  %v962_v24 = vld [vmem:[#allocation9_spill] sm:$0xff] }
 0x31c   :  { %545 = vst [vmem:[#allocation5 + $0x90] sm:$0xff] %v513_v33  ;;  %546 = vst [vmem:[#allocation5 + $0x98] sm:$0xff] %v514_v29 }
 0x31d   :  { %551 = vst [vmem:[#allocation5 + $0xc0] sm:$0xff] %v519_v34  ;;  %552 = vst [vmem:[#allocation5 + $0xc8] sm:$0xff] %v520_v44  ;;  %v478_v12 = vpop.permute.xlu1 %477  ;;  %v490_v13 = vpop.permute.xlu0 %489 }
 0x31e   :  { %v517_v45 = vmul.f32 %v478_v12, %v775_v18  ;;  %v518_v35 = vmul.f32 %v478_v12, %v959_v3  ;;  %v523_v7 = vmul.f32 %v490_v13, %v960_v40  ;;  %v524_v5 = vmul.f32 %v490_v13, %v961_v11 }
 0x320   :  { %549 = vst [vmem:[#allocation5 + $0xb0] sm:$0xff] %v517_v45  ;;  %550 = vst [vmem:[#allocation5 + $0xb8] sm:$0xff] %v518_v35 }
 0x321   :  { %555 = vst [vmem:[#allocation5 + $0xe0] sm:$0xff] %v523_v7  ;;  %556 = vst [vmem:[#allocation5 + $0xe8] sm:$0xff] %v524_v5  ;;  %v486_v6 = vpop.permute.xlu1 %485 }
 0x322   :  { %v521_v25 = vmul.f32 %v486_v6, %v962_v24  ;;  %v522_v62 = vmul.f32 %v486_v6, %v963_v46 }
 0x324   :  { %553 = vst [vmem:[#allocation5 + $0xd0] sm:$0xff] %v521_v25  ;;  %554 = vst [vmem:[#allocation5 + $0xd8] sm:$0xff] %v522_v62 }
 0x325   :  { %v494_v18 = vpop.permute.xlu1 %493 }
 0x326   :  { %v525_v22 = vmul.f32 %v494_v18, %v964_v16  ;;  %v526_v28 = vmul.f32 %v494_v18, %v965_v63 }
 0x328   :  { %557 = vst [vmem:[#allocation5 + $0xf0] sm:$0xff] %v525_v22  ;;  %558 = vst [vmem:[#allocation5 + $0xf8] sm:$0xff] %v526_v28 }
 0x329   :  { %672 = shalt.err (!%p669_p12)
}
 0x32a   :  { %s673_s6 = scalar_lea.hbm %s944_s5, 4096 }
 0x32b   :  { %p674_p13 = scmp.ne.s32.totalorder %s944_s5, %s673_s6  ;;  %p677_p0 = scmp.lt.u32.totalorder %s673_s6, %s944_s5 }
 0x32d   :  { %p679_p1 = pnand %p677_p0, %p674_p13 }
 0x32f   :  { %682 = shalt.err (!%p679_p1)
}
 0x330   :  { %570 = dma.vmem_to_hbm [thread:$0]  %s565_s3, 4096, %s944_s5, [#allocation4], %s688_s28, %s688_s28, %s689_s29  }
 0x331   :  { %685 = dma.done.wait [#allocation4], 4096  }
 0x332   :  { %686 = vsyncadd [#allocation4], 4294963200 }
 0x333   :  { %574 = vsyncpa [#allocation3], 1 }
 0x334   :  { %575 = vsyncpa [#allocation4], 1 }

</bundles_post_ra>
